<compile_context>
chip_gen: v7x
topology: tpu7x:2x2x1
jax: 0.10.0
libtpu: 0.0.40
codegen_flags: <defaults>
</compile_context>

<pallas_src>
import jax
import jax.numpy as jnp
from jax.experimental import pallas as pl
from jax.experimental.pallas import tpu as pltpu


def _round_up(x, m):
    return ((x + m - 1) // m) * m


# ---------------------------------------------------------------------------
# Kernel
# ---------------------------------------------------------------------------
def _attention_kernel(x_ref, w_ref, o_ref):
    # x_ref: (TB, S, H)  block of lstm_out (full S/H extents, no padding)
    # w_ref: (1, H)      lane-dense attention weight, same dtype as x
    # o_ref: (TB, H)     context output block
    x = x_ref[...]                                           # (TB, S, H)
    w = w_ref[...]                                           # (1, H)

    # scores[b, s] = sum_h x[b, s, h] * w[h]
    # VPU broadcast-multiply in the native dtype, f32-accumulated lane reduce
    # (avoids a block-sized f32 upcast and a lane-sparse N=1 MXU matmul).
    scores = jnp.sum(x * w[None, :, :], axis=-1, dtype=jnp.float32)   # (TB, S)

    # Softmax over the sequence axis.  The Linear bias is dropped on purpose:
    # softmax is shift-invariant, so "+ b" cancels exactly.
    m = jnp.max(scores, axis=-1, keepdims=True)              # (TB, 1)
    e = jnp.exp(scores - m)                                   # (TB, S)
    denom = jnp.sum(e, axis=-1, keepdims=True)                # (TB, 1)

    # Unnormalized context on the MXU: (1, S) @ (S, H) per batch row.
    ctx = jnp.einsum(
        "bqs,bsh->bqh",
        e[:, None, :].astype(x.dtype),
        x,
        preferred_element_type=jnp.float32,
    )                                                         # (TB, 1, H)

    # Normalize AFTER the matmul, in f32, on the small (TB, H) result.
    o_ref[...] = (ctx[:, 0, :] * pl.reciprocal(denom)).astype(o_ref.dtype)


# ---------------------------------------------------------------------------
# Wrapper
# ---------------------------------------------------------------------------
def _vmem_budget():
    """Per-chip x-buffer budget and scoped-VMEM limit."""
    default_cap = 64 * 1024 * 1024                 # conservative (v7x per-TC)
    try:
        info = pltpu.get_tpu_info()
        cap = int(getattr(info, "vmem_capacity_bytes", default_cap))
    except Exception:
        cap = default_cap
    vmem_limit = (cap * 3) // 4                    # 96 MiB v5e/v6e, 48 MiB v7x
    # x block is double-buffered + one block-sized product intermediate
    # (3x the budget) stays well inside vmem_limit.
    x_buf_budget = (cap * 3) // 16                 # 24 MiB v5e/v6e, 12 MiB v7x
    return x_buf_budget, vmem_limit


def _choose_batch_tile(B, tb_max):
    """Return (TB, B_pad): batch-tile size and (possibly padded) batch."""
    tb_max = max(1, tb_max)
    if B <= tb_max:
        if B >= 16 and B % 16 == 0:
            # Large batch that fits entirely: still split into 2 equal,
            # multiple-of-8 steps so both v7x TensorCores get balanced work.
            return B // 2, B
        return B, B                                # single full-extent step
    if tb_max < 8:
        # A single batch row barely fits the per-buffer budget.
        # TODO(synk): tile the sequence axis with an online (flash-style)
        # softmax (grid=(batch, seq), seq axis "arbitrary", pl.when
        # init/finalize) instead of sub-8 batch tiles with masked stores.
        tb = tb_max
        return tb, _round_up(B, tb)
    tb = (tb_max // 8) * 8                         # sublane-dense output tiles
    steps = pl.cdiv(B, tb)
    if steps % 2 == 1:
        # Prefer an even number of grid steps (v7x has 2 TensorCores).
        alt = _round_up(pl.cdiv(B, steps + 1), 8)
        if 8 <= alt <= tb:
            tb = alt
    return tb, _round_up(B, tb)


def attention_forward(lstm_out, w, b):
    """
    lstm_out: (B, S, H)  float
    w:        (1, H)     nn.Linear(hidden, 1).weight
    b:        (1,)       nn.Linear(hidden, 1).bias (unused: cancels in softmax)
    returns:  (B, H)     context vectors
    """
    del b  # softmax shift-invariance: "+ b" before softmax is a no-op.

    B, S, H = lstm_out.shape
    dtype = lstm_out.dtype

    x_buf_budget, vmem_limit = _vmem_budget()
    bytes_per_row = S * H * jnp.dtype(dtype).itemsize
    tb_max = max(1, x_buf_budget // bytes_per_row)
    TB, B_pad = _choose_batch_tile(B, tb_max)

    x = lstm_out
    if B_pad != B:
        # Batch-remainder padding only: (B_pad - B) * S * H extra bytes,
        # tiny compared to the former full-tensor S/H pad.
        x = jnp.pad(x, ((0, B_pad - B), (0, 0), (0, 0)))

    w_k = jnp.reshape(w, (1, H)).astype(dtype)     # lane-dense weight row

    out = pl.pallas_call(
        _attention_kernel,
        out_shape=jax.ShapeDtypeStruct((B_pad, H), dtype),
        grid_spec=pltpu.PrefetchScalarGridSpec(
            num_scalar_prefetch=0,
            grid=(B_pad // TB,),
            in_specs=[
                # Full (S, H) extents -> (8,128) divisibility rule waived.
                pl.BlockSpec((TB, S, H), lambda i: (i, 0, 0)),
                pl.BlockSpec((1, H), lambda i: (0, 0)),
            ],
            out_specs=pl.BlockSpec((TB, H), lambda i: (i, 0)),
        ),
        compiler_params=pltpu.CompilerParams(
            dimension_semantics=("parallel",),
            vmem_limit_bytes=vmem_limit,
        ),
    )(x, w_k)

    return out[:B]


def attention_reference(lstm_out, w, b):
    # Pure-JAX reference matching the PyTorch module exactly (bias included).
    scores = jnp.einsum("bsh,oh->bso", lstm_out, w) + b          # (B, S, 1)
    weights = jax.nn.softmax(scores, axis=1)                     # softmax over seq
    return jnp.sum(weights * lstm_out, axis=1)                   # (B, H)


if __name__ == "__main__":
    key = jax.random.PRNGKey(0)
    k_x, k_w, k_b = jax.random.split(key, 3)

    B, S, H = 2, 8, 32  # batch, seq_len, hidden_size

    lstm_out = jax.random.normal(k_x, (B, S, H), dtype=jnp.float32)

    # Deterministic init of nn.Linear(hidden_size, 1) parameters.
    bound = 1.0 / (H ** 0.5)
    w = jax.random.uniform(k_w, (1, H), minval=-bound, maxval=bound,
                           dtype=jnp.float32)
    b = jax.random.uniform(k_b, (1,), minval=-bound, maxval=bound,
                           dtype=jnp.float32)

    out = attention_forward(lstm_out, w, b)
    out = jax.block_until_ready(out)

    ref = attention_reference(lstm_out, w, b)
    assert out.shape == (B, H)
    assert jnp.allclose(out, ref, atol=1e-5, rtol=1e-5), "mismatch vs reference"

    print("KERNEL_OK")
</pallas_src>

<mosaic_0001>
module attributes {stable_mosaic.version = 11 : i64} {
  func.func @_attention_kernel(%arg0: i32, %arg1: memref<2x8x32xf32, #tpu.memory_space<vmem>>, %arg2: memref<1x32xf32, #tpu.memory_space<vmem>>, %arg3: memref<2x32xf32, #tpu.memory_space<vmem>>) attributes {dimension_semantics = [#tpu.dimension_semantics<parallel>], iteration_bounds = array<i64: 1>, scalar_prefetch = 0 : i64, scratch_operands = 0 : i64, tpu.core_type = #tpu.core_type<tc>, window_params = [{transform_indices = @transform_0, window_bounds = array<i64: 2, 8, 32>}, {pipeline_mode = #tpu.pipeline_mode<synchronous>, transform_indices = @transform_1, window_bounds = array<i64: 1, 32>}, {transform_indices = @transform_2, window_bounds = array<i64: 2, 32>}]} {
    %c0 = arith.constant 0 : index
    %c0_0 = arith.constant 0 : index
    %c0_1 = arith.constant 0 : index
    %0 = vector.load %arg1[%c0, %c0_0, %c0_1] : memref<2x8x32xf32, #tpu.memory_space<vmem>>, vector<2x8x32xf32>
    %c0_2 = arith.constant 0 : index
    %c0_3 = arith.constant 0 : index
    %1 = vector.load %arg2[%c0_2, %c0_3] : memref<1x32xf32, #tpu.memory_space<vmem>>, vector<1x32xf32>
    %2 = vector.shape_cast %1 : vector<1x32xf32> to vector<1x1x32xf32>
    %3 = vector.broadcast %2 : vector<1x1x32xf32> to vector<2x8x32xf32>
    %4 = arith.mulf %0, %3 : vector<2x8x32xf32>
    %cst = arith.constant dense<0.000000e+00> : vector<2x8xf32>
    %5 = vector.multi_reduction <add>, %4, %cst [2] : vector<2x8x32xf32> to vector<2x8xf32>
    %cst_4 = arith.constant dense<0xFF800000> : vector<2xf32>
    %6 = vector.multi_reduction <maximumf>, %5, %cst_4 [1] : vector<2x8xf32> to vector<2xf32>
    %7 = vector.shape_cast %6 : vector<2xf32> to vector<2x1xf32>
    %8 = vector.broadcast %7 : vector<2x1xf32> to vector<2x8xf32>
    %9 = arith.subf %5, %8 : vector<2x8xf32>
    %10 = math.exp %9 : vector<2x8xf32>
    %cst_5 = arith.constant dense<0.000000e+00> : vector<2xf32>
    %11 = vector.multi_reduction <add>, %10, %cst_5 [1] : vector<2x8xf32> to vector<2xf32>
    %12 = vector.shape_cast %11 : vector<2xf32> to vector<2x1xf32>
    %13 = vector.shape_cast %10 : vector<2x8xf32> to vector<2x1x8xf32>
    "tpu.trace_start"() <{level = 10 : i32, message = "bqs,bsh->bqh"}> : () -> ()
    %cst_6 = arith.constant dense<0.000000e+00> : vector<2x1x32xf32>
    %14 = tpu.matmul %13, %0, %cst_6 {dimension_numbers = #tpu.dot_dimension_numbers<[2], [1], [1], [2], [0, 0, 0, 1, 1, 2], [0], [0]>} : vector<2x1x8xf32>, vector<2x8x32xf32>, vector<2x1x32xf32> -> vector<2x1x32xf32>
    "tpu.trace_stop"() : () -> ()
    %15 = vector.shape_cast %14 : vector<2x1x32xf32> to vector<2x32xf32>
    %16 = tpu.reciprocal %12 : vector<2x1xf32> -> vector<2x1xf32>
    %17 = vector.broadcast %16 : vector<2x1xf32> to vector<2x32xf32>
    %18 = arith.mulf %15, %17 : vector<2x32xf32>
    %c0_7 = arith.constant 0 : index
    %c0_8 = arith.constant 0 : index
    %19 = vector.load %arg3[%c0_7, %c0_8] : memref<2x32xf32, #tpu.memory_space<vmem>>, vector<2x32xf32>
    tpu.vector_store %arg3[%c0_7, %c0_8], %18 {strides = array<i32>} : memref<2x32xf32, #tpu.memory_space<vmem>>, vector<2x32xf32>,
    return
  }
  func.func @transform_0(%arg0: i32) -> (i32, i32, i32) {
    %c0_i32 = arith.constant 0 : i32
    %c0_i32_0 = arith.constant 0 : i32
    %c0_i32_1 = arith.constant 0 : i32
    return %arg0, %c0_i32, %c0_i32_0 : i32, i32, i32
  }
  func.func @transform_1(%arg0: i32) -> (i32, i32) {
    %c0_i32 = arith.constant 0 : i32
    %c0_i32_0 = arith.constant 0 : i32
    %c0_i32_1 = arith.constant 0 : i32
    return %c0_i32, %c0_i32_0 : i32, i32
  }
  func.func @transform_2(%arg0: i32) -> (i32, i32) {
    %c0_i32 = arith.constant 0 : i32
    %c0_i32_0 = arith.constant 0 : i32
    return %arg0, %c0_i32 : i32, i32
  }
}

</mosaic_0001>

<bundles_post_ra>
// kernel: tpu_custom_call.1
= control target key start
LH: loop header
LB: loop body
LE: loop exit
PB: predicated region body
PF: predicated region fallthrough
CT: control target
= control target key end

     0   :  { %7 = vsyncpa [#allocation3], 0  ;;  %s409_s0 = inlined_call_operand.hbm [shape: f32[2,8,32], index: 0, kind: input, shape index: {}]   ;;  %s410_s1 = inlined_call_operand.vmem [shape: f32[1,32], index: 1, kind: input, shape index: {}]   ;;  %s411_s2 = inlined_call_operand.hbm [shape: f32[2,32], index: 2, kind: output, shape index: {}]  }
   0x1   :  { %8 = vsyncpa [#allocation4], 0  ;;  %s355_s9 = smov [#allocation2]   ;;  %s307_s13 = scalar_lea.hbm %s409_s0, 256 }
   0x2   :  { %s14_s10 = sshll.u32 %s355_s9, 4  ;;  %p308_p0 = scmp.ne.s32.totalorder %s409_s0, %s307_s13  ;;  %s15_s10 = int_to_ptr.vmem [resolvable:$true] %s14_s10 }
   0x3   :  { %p311_p1 = scmp.lt.u32.totalorder %s307_s13, %s409_s0 }
   0x5   :  { %p313_p2 = pnand %p311_p1, %p308_p0 }
   0x7   :  { %316 = shalt.err (!%p313_p2)
}
   0x8   :  { %s317_s18 = scalar_lea.vmem %s15_s10, 256  ;;  %p322_p4 = scmp.lt.s32.totalorder %s15_s10, %s15_s10 }
   0x9   :  { %p318_p3 = scmp.ne.s32.totalorder %s15_s10, %s317_s18  ;;  %p323_p5 = scmp.lt.s32.totalorder %s317_s18, %s317_s18 }
   0xb   :  { %p324_p6 = por %p323_p5, %p322_p4 }
   0xd   :  { %p325_p7 = pnand %p324_p6, %p318_p3 }
   0xf   :  { %328 = shalt.err (!%p325_p7)
}
  0x10   :  { %s356_s19 = smov 128   ;;  %s357_s20 = smov 8  }
  0x11   :  { %20 = dma.hbm_to_vmem [thread:$0]  %s409_s0, 256, %s15_s10, [#allocation3], %s356_s19, %s356_s19, %s357_s20  }
  0x12   :  { %351 = dma.done.wait [#allocation3], 256  }
  0x13   :  { %352 = vsyncadd [#allocation3], 4294967040  ;;  %v26_v0 = vld [vmem:[#allocation2] sm:$0xff]  ;;  %vm37_vm0 = vcmask 261120   ;;  %v27_v2 = vld [vmem:[#allocation2 + $0x8] sm:$0xff]  ;;  %v46_v7 = vlaneseq  ;;  %vm56_vm1 = vcmask 1041409  }
  0x14   :  { %v275_v1 = vld [vmem:[%s410_s1] ss:$0 sm:$0xff]  ;;  %vm59_vm2 = vcmask 58368   ;;  %v358_v17 = vmov 0   ;;  %v359_v29 = vmov 0.0   ;;  %vm360_vm3 = vmmov 0  }
  0x15   :  { %v35_v3 = vmul.f32 %v275_v1, %v26_v0  ;;  %v36_v4 = vmul.f32 %v275_v1, %v27_v2  ;;  %v47_v8 = vand.u32 127, %v46_v7  ;;  %v49_v9 = vshrl.u32 %v46_v7, 7  ;;  %300 = vset.pattern.permute.xlu0 %v358_v17  ;;  %299 = vset.pattern.permute.xlu1 %v358_v17  ;;  %s361_s0 = smov [#allocation5]  }
  0x16   :  { %282 = vmatprep.subr.mxu0 %v359_v29  ;;  %287 = vmatprep.subr.mxu1 %v359_v29  ;;  %vm101_vm4 = vcmask 64512   ;;  %s266_s1 = sshll.u32 %s361_s0, 4  ;;  %vm258_vm5 = vcmask 254976   ;;  %s267_s1 = int_to_ptr.vmem [resolvable:$true] %s266_s1 }
  0x17   :  { %v38_v5 = vsel %vm37_vm0, %v35_v3, 0.0  ;;  %v41_v6 = vsel %vm37_vm0, %v36_v4, 0.0  ;;  %v50_v11 = vsub.s32 %v47_v8, %v49_v9  ;;  %v66_v18 = vsub.s32 0, %v49_v9  ;;  %283 = vmatpush3.msra.mxu0 %v26_v0  ;;  %284 = vmatprep.mubr.msk.f32.mxu0 %vm360_vm3, %v359_v29  ;;  %s329_s25 = scalar_lea.vmem %s267_s1, 32  ;;  %p334_p9 = scmp.lt.s32.totalorder %s267_s1, %s267_s1 }
  0x18   :  { %39 = vadd.xlane.f32.xlu0 %v38_v5  ;;  %v70_v19 = vsub.s32 1, %v49_v9  ;;  %288 = vmatpush3.msra.mxu1 %v27_v2  ;;  %p330_p8 = scmp.ne.s32.totalorder %s267_s1, %s329_s25  ;;  %p335_p10 = scmp.lt.s32.totalorder %s329_s25, %s329_s25 }
  0x19   :  { %289 = vmatprep.mubr.msk.f32.mxu1 %vm360_vm3, %v359_v29 }
  0x1a   :  { %p336_p11 = por %p335_p10, %p334_p9 }
  0x1c   :  { %42 = vadd.xlane.f32.xlu0 %v41_v6  ;;  %p337_p12 = pnand %p336_p11, %p330_p8 }
  0xa5   :  { %v40_v10 = vpop.xlane.xlu0 %39 }
  0xa6   :  { %v51_v13 = vrot.slane %v40_v10, %v50_v11 }
  0xa9   :  { %v43_v12 = vpop.xlane.xlu0 %42 }
  0xaa   :  { %v55_v14 = vrot.slane %v43_v12, %v50_v11 }
  0xac   :  { %v57_v15 = vsel %vm56_vm1, %v55_v14, %v51_v13 }
  0xad   :  { %v60_v16 = vsel %vm59_vm2, %v57_v15, -inf }
  0xae   :  { %61 = vmax.xlane.f32.xlu1 %v60_v16 }
 0x13b   :  { %v62_v20 = vpop.xlane.xlu1 %61 }
 0x13c   :  { %v67_v21 = vrot.slane %v62_v20, %v66_v18  ;;  %v71_v22 = vrot.slane %v62_v20, %v70_v19 }
 0x13e   :  { %v74_v23 = vsub.f32 %v40_v10, %v67_v21  ;;  %v75_v24 = vsub.f32 %v43_v12, %v71_v22 }
 0x140   :  { %v76_v25 = vmul.f32 1.442695, %v74_v23  ;;  %v78_v26 = vmul.f32 1.442695, %v75_v24 }
 0x142   :  { %301 = vpow2.f32 %v76_v25 }
 0x143   :  { %303 = vpow2.f32 %v78_v26 }
 0x14c   :  { %v302_v27 = vpop.eup %301 }
 0x14d   :  { %v304_v28 = vpop.eup %303  ;;  %83 = vperm.xlu0 %300, %v302_v27  }
 0x14e   :  { %86 = vperm.xlu1 %299, %v304_v28  }
 0x1cc   :  { %v84_v30 = vpop.permute.xlu0 %83 }
 0x1cd   :  { %v87_v31 = vpop.permute.xlu1 %86  ;;  %v91_v32 = vrot.slane %v84_v30, %v50_v11 }
 0x1ce   :  { %v95_v33 = vrot.slane %v87_v31, %v50_v11 }
 0x1cf   :  { %285 = vmatmul.mubr.msk.f32.vlgmr.msra.gmra.mrb[0].mxu0 %vm101_vm4, %v91_v32 }
 0x1d0   :  { %290 = vmatmul.mubr.msk.f32.vlgmr.msra.gmra.mrb[0].mxu1 %vm101_vm4, %v95_v33  ;;  %v96_v34 = vsel %vm56_vm1, %v95_v33, %v91_v32 }
 0x1d1   :  { %v98_v35 = vsel %vm59_vm2, %v96_v34, 0.0 }
 0x1d2   :  { %99 = vadd.xlane.f32.xlu1 %v98_v35 }
 0x25f   :  { %v100_v36 = vpop.xlane.xlu1 %99 }
 0x260   :  { %305 = vrcp.f32 %v100_v36 }
 0x26a   :  { %v306_v37 = vpop.eup %305 }
 0x26b   :  { %v248_v39 = vrot.slane %v306_v37, 1 }
 0x2a2   :  { %v170_v38 = vpop.f32.mrb[0].mxu0 }
 0x2a3   :  { %v242_v40 = vpop.f32.mrb[0].mxu1  ;;  %v286_v41 = vpop.f32.mrb[1].mxu0  ;;  %v251_v44 = vmul.f32 %v306_v37, %v170_v38 }
 0x2a4   :  { %v252_v42 = vmul.f32 %v248_v39, %v242_v40  ;;  %v291_v43 = vpop.f32.mrb[1].mxu1 }
 0x2a6   :  { %v255_v45 = vrot.slane %v252_v42, 7 }
 0x2a8   :  { %v256_v46 = vsel %vm56_vm1, %v255_v45, %v251_v44 }
 0x2a9   :  { %259 = vst.msk [vmem:[#allocation5] sm:$0x3] %vm258_vm5, %v256_v46 }
 0x2aa   :  { %340 = shalt.err (!%p337_p12)
}
 0x2ab   :  { %s341_s28 = scalar_lea.hbm %s411_s2, 32 }
 0x2ac   :  { %p342_p13 = scmp.ne.s32.totalorder %s411_s2, %s341_s28  ;;  %p345_p0 = scmp.lt.u32.totalorder %s341_s28, %s411_s2 }
 0x2ae   :  { %p347_p1 = pnand %p345_p0, %p342_p13 }
 0x2b0   :  { %350 = shalt.err (!%p347_p1)
}
 0x2b1   :  { %269 = dma.vmem_to_hbm [thread:$0]  %s267_s1, 32, %s411_s2, [#allocation4]  }
 0x2b2   :  { %353 = dma.done.wait [#allocation4], 32  }
 0x2b3   :  { %354 = vsyncadd [#allocation4], 4294967264 }
 0x2b4   :  { %273 = vsyncpa [#allocation3], 1 }
 0x2b5   :  { %274 = vsyncpa [#allocation4], 1 }

</bundles_post_ra>
